<compile_context>
chip_gen: v7x
topology: tpu7x:2x2x1
jax: 0.10.0
libtpu: 0.0.40
codegen_flags: <defaults>
</compile_context>

<pallas_src>
import numpy as np
import jax
import jax.numpy as jnp
from jax.experimental import pallas as pl
from jax.experimental.pallas import tpu as pltpu

# ---- hyperparameters implied by the module (small, synthetic) ----
VOCAB_SIZE = 32
EMBEDDING_SIZE = 8            # E
SEQUENCE_LEN = 8              # S
NUM_CLASSES = 2
FILTER_SIZES = (2, 3, 4)
NUM_FILTERS = 4               # filters per size
NUM_FILTERS_TOTAL = NUM_FILTERS * len(FILTER_SIZES)      # 12
BATCH = 2

FS_MAX = max(FILTER_SIZES)                               # 4
T_MAX = SEQUENCE_LEN - min(FILTER_SIZES) + 1             # 7 conv positions
S_PAD = SEQUENCE_LEN + FS_MAX - 1                        # 11 (zero-padded time)
NEG_INF = -1e9                                           # masks invalid positions

# ---- packed parameter slab layout (static row offsets) ----
BIASMASK_ROW = FS_MAX * EMBEDDING_SIZE                           # 32
LIN_W_ROW = ((BIASMASK_ROW + T_MAX * BATCH + 7) // 8) * 8        # 48
LIN_B_ROW = LIN_W_ROW + NUM_FILTERS_TOTAL                        # 60
SLAB_ROWS = ((LIN_B_ROW + 1 + 7) // 8) * 8                       # 64
SLAB_COLS = NUM_FILTERS_TOTAL                                    # 12


def textcnn_kernel(ids_ref, emb_ref, slab_ref, out_ref, ebuf_ref):
    """Fused embedding-gather + conv + ReLU + max-over-time + linear."""
    # ---- 1) in-kernel embedding gather into a sequence-major scratch ----
    # ebuf row s*B + b = embedding of token ids[b, s];  rows past the sequence
    # end are zero so shifted tap reads below are always in-range.
    pad_rows = (S_PAD - SEQUENCE_LEN) * BATCH
    ebuf_ref[pl.ds(SEQUENCE_LEN * BATCH, pad_rows), :] = jnp.zeros(
        (pad_rows, EMBEDDING_SIZE), jnp.float32)
    for s in range(SEQUENCE_LEN):
        for b in range(BATCH):
            tok = ids_ref[b, s]                       # scalar from SMEM
            ebuf_ref[pl.ds(s * BATCH + b, 1), :] = emb_ref[tok]   # (1, E)

    # ---- 2) all convolutions as FS_MAX tap matmuls vs. packed weights ----
    # conv[t*B + b, c] over all NUM_FILTERS_TOTAL filters at once; taps k >= fs
    # of a group are zero in the packed weight, so they contribute nothing.
    conv = jnp.zeros((T_MAX * BATCH, NUM_FILTERS_TOTAL), jnp.float32)
    for k in range(FS_MAX):
        lhs = ebuf_ref[pl.ds(k * BATCH, T_MAX * BATCH), :]               # (14, E)
        w_k = slab_ref[pl.ds(k * EMBEDDING_SIZE, EMBEDDING_SIZE), :]     # (E, 12)
        conv = conv + jnp.dot(lhs, w_k, preferred_element_type=jnp.float32)

    # ---- 3) bias + validity mask (pre-folded, additive), ReLU, max over t ----
    h = jnp.maximum(conv + slab_ref[pl.ds(BIASMASK_ROW, T_MAX * BATCH), :], 0.0)
    pooled = h[0:BATCH, :]
    for t in range(1, T_MAX):
        pooled = jnp.maximum(pooled, h[t * BATCH:(t + 1) * BATCH, :])    # (B, 12)

    # ---- 4) classifier (filters already contiguous in lanes: no concat) ----
    lin_w = slab_ref[pl.ds(LIN_W_ROW, NUM_FILTERS_TOTAL), pl.ds(0, NUM_CLASSES)]
    lin_b = slab_ref[pl.ds(LIN_B_ROW, 1), pl.ds(0, NUM_CLASSES)]
    out_ref[...] = jnp.dot(pooled, lin_w,
                           preferred_element_type=jnp.float32) + lin_b


def init_params(key):
    """Parameters mirroring the PyTorch module (Conv2d weight (F,1,fs,E) stored
    with the singleton channel squeezed; Linear weight stored transposed)."""
    ks = jax.random.split(key, 2 + 2 * len(FILTER_SIZES))
    params = {"embedding": jax.random.normal(
        ks[0], (VOCAB_SIZE, EMBEDDING_SIZE), jnp.float32) * 0.1}
    for i, fs in enumerate(FILTER_SIZES):
        params[f"conv{fs}_w"] = jax.random.normal(
            ks[1 + 2 * i], (NUM_FILTERS, fs, EMBEDDING_SIZE), jnp.float32) * 0.1
        params[f"conv{fs}_b"] = jax.random.normal(
            ks[2 + 2 * i], (NUM_FILTERS,), jnp.float32) * 0.1
    wl = jax.random.normal(ks[-1], (NUM_CLASSES, NUM_FILTERS_TOTAL),
                           jnp.float32) * 0.1
    params["lin_w"] = wl.T                                  # (12, 2)
    params["lin_b"] = jnp.ones((NUM_CLASSES,), jnp.float32)  # Bias = ones
    return params


def pack_params(params):
    """One-time parameter preprocessing: (VOCAB,1,E) table for leading-dim
    dynamic indexing + a single (64, 12) f32 slab holding conv weights (tap-
    major, zero-padded), fused conv-bias/position-mask, linear weight & bias."""
    emb3d = jnp.asarray(params["embedding"], jnp.float32).reshape(
        VOCAB_SIZE, 1, EMBEDDING_SIZE)

    slab = np.zeros((SLAB_ROWS, SLAB_COLS), np.float32)
    for g, fs in enumerate(FILTER_SIZES):
        w = np.asarray(params[f"conv{fs}_w"], np.float32)    # (F, fs, E)
        b = np.asarray(params[f"conv{fs}_b"], np.float32)    # (F,)
        cols = slice(g * NUM_FILTERS, (g + 1) * NUM_FILTERS)
        for k in range(fs):                                  # taps k >= fs stay 0
            slab[k * EMBEDDING_SIZE:(k + 1) * EMBEDDING_SIZE, cols] = w[:, k, :].T
        last_valid_t = SEQUENCE_LEN - fs
        for t in range(T_MAX):
            rows = slice(BIASMASK_ROW + t * BATCH, BIASMASK_ROW + (t + 1) * BATCH)
            slab[rows, cols] = b[None, :] if t <= last_valid_t else NEG_INF
    slab[LIN_W_ROW:LIN_W_ROW + NUM_FILTERS_TOTAL, :NUM_CLASSES] = np.asarray(
        params["lin_w"], np.float32)
    slab[LIN_B_ROW, :NUM_CLASSES] = np.asarray(params["lin_b"], np.float32)
    return emb3d, jnp.asarray(slab)


@jax.jit
def textcnn_forward(x_ids, emb3d, slab):
    # Single invocation, no grid: total live data is a few KiB.
    # (If BATCH ever scales: add a batch grid marked "parallel" and make the
    #  output lane-dense; unnecessary at B=2.)
    return pl.pallas_call(
        textcnn_kernel,
        out_shape=jax.ShapeDtypeStruct((BATCH, NUM_CLASSES), jnp.float32),
        in_specs=[
            pl.BlockSpec(memory_space=pltpu.MemorySpace.SMEM),   # token ids
            pl.BlockSpec(memory_space=pltpu.MemorySpace.VMEM),   # embedding table
            pl.BlockSpec(memory_space=pltpu.MemorySpace.VMEM),   # packed params
        ],
        out_specs=pl.BlockSpec(memory_space=pltpu.MemorySpace.VMEM),
        scratch_shapes=[pltpu.VMEM((S_PAD * BATCH, EMBEDDING_SIZE), jnp.float32)],
    )(x_ids, emb3d, slab)


def textcnn_reference(x_ids, params):
    """Pure-JAX reference mirroring the PyTorch forward semantics."""
    emb = jnp.take(params["embedding"], x_ids, axis=0)        # (B, S, E)
    feats = []
    for fs in FILTER_SIZES:
        w = params[f"conv{fs}_w"]                             # (F, fs, E)
        b = params[f"conv{fs}_b"]                             # (F,)
        convs = []
        for t in range(SEQUENCE_LEN - fs + 1):
            convs.append(jnp.einsum("bke,fke->bf", emb[:, t:t + fs, :], w) + b)
        h = jnp.maximum(jnp.stack(convs, axis=1), 0.0)        # (B, T, F)
        feats.append(jnp.max(h, axis=1))                      # (B, F)
    h_pool = jnp.concatenate(feats, axis=-1)                  # (B, 12)
    return h_pool @ params["lin_w"] + params["lin_b"]


if __name__ == "__main__":
    key = jax.random.PRNGKey(0)
    k_param, k_x = jax.random.split(key)
    params = init_params(k_param)
    emb3d, slab = pack_params(params)
    x = jax.random.randint(k_x, (BATCH, SEQUENCE_LEN), 0, VOCAB_SIZE,
                           dtype=jnp.int32)

    out = jax.block_until_ready(textcnn_forward(x, emb3d, slab))
    ref = jax.block_until_ready(textcnn_reference(x, params))

    assert out.shape == (BATCH, NUM_CLASSES)
    assert jnp.allclose(out, ref, rtol=1e-3, atol=1e-3), (out, ref)
    print("KERNEL_OK")
</pallas_src>

<mosaic_0001>
module attributes {stable_mosaic.version = 11 : i64} {
  func.func @textcnn_kernel(%arg0: memref<2x8xi32, #tpu.memory_space<smem>>, %arg1: memref<32x1x8xf32, #tpu.memory_space<vmem>>, %arg2: memref<64x12xf32, #tpu.memory_space<vmem>>, %arg3: memref<2x2xf32, #tpu.memory_space<vmem>>, %arg4: memref<22x8xf32, #tpu.memory_space<vmem>>) attributes {dimension_semantics = [], scalar_prefetch = 0 : i64, scratch_operands = 1 : i64, tpu.core_type = #tpu.core_type<tc>} {
    %cst = arith.constant 0.000000e+00 : f32
    %0 = vector.broadcast %cst : f32 to vector<6x8xf32>
    %c16 = arith.constant 16 : index
    %c0 = arith.constant 0 : index
    %1 = vector.load %arg4[%c16, %c0] : memref<22x8xf32, #tpu.memory_space<vmem>>, vector<6x8xf32>
    tpu.vector_store %arg4[%c16, %c0], %0 {strides = array<i32>} : memref<22x8xf32, #tpu.memory_space<vmem>>, vector<6x8xf32>,
    %c0_0 = arith.constant 0 : index
    %c0_1 = arith.constant 0 : index
    %2 = memref.load %arg0[%c0_0, %c0_1] : memref<2x8xi32, #tpu.memory_space<smem>>
    %3 = arith.index_cast %2 : i32 to index
    %c0_2 = arith.constant 0 : index
    %c0_3 = arith.constant 0 : index
    %4 = vector.load %arg1[%3, %c0_2, %c0_3] : memref<32x1x8xf32, #tpu.memory_space<vmem>>, vector<1x1x8xf32>
    %5 = vector.shape_cast %4 : vector<1x1x8xf32> to vector<1x8xf32>
    %c0_4 = arith.constant 0 : index
    %c0_5 = arith.constant 0 : index
    %6 = vector.load %arg4[%c0_4, %c0_5] : memref<22x8xf32, #tpu.memory_space<vmem>>, vector<1x8xf32>
    tpu.vector_store %arg4[%c0_4, %c0_5], %5 {strides = array<i32>} : memref<22x8xf32, #tpu.memory_space<vmem>>, vector<1x8xf32>,
    %c1 = arith.constant 1 : index
    %c0_6 = arith.constant 0 : index
    %7 = memref.load %arg0[%c1, %c0_6] : memref<2x8xi32, #tpu.memory_space<smem>>
    %8 = arith.index_cast %7 : i32 to index
    %c0_7 = arith.constant 0 : index
    %c0_8 = arith.constant 0 : index
    %9 = vector.load %arg1[%8, %c0_7, %c0_8] : memref<32x1x8xf32, #tpu.memory_space<vmem>>, vector<1x1x8xf32>
    %10 = vector.shape_cast %9 : vector<1x1x8xf32> to vector<1x8xf32>
    %c1_9 = arith.constant 1 : index
    %c0_10 = arith.constant 0 : index
    %11 = vector.load %arg4[%c1_9, %c0_10] : memref<22x8xf32, #tpu.memory_space<vmem>>, vector<1x8xf32>
    tpu.vector_store %arg4[%c1_9, %c0_10], %10 {strides = array<i32>} : memref<22x8xf32, #tpu.memory_space<vmem>>, vector<1x8xf32>,
    %c0_11 = arith.constant 0 : index
    %c1_12 = arith.constant 1 : index
    %12 = memref.load %arg0[%c0_11, %c1_12] : memref<2x8xi32, #tpu.memory_space<smem>>
    %13 = arith.index_cast %12 : i32 to index
    %c0_13 = arith.constant 0 : index
    %c0_14 = arith.constant 0 : index
    %14 = vector.load %arg1[%13, %c0_13, %c0_14] : memref<32x1x8xf32, #tpu.memory_space<vmem>>, vector<1x1x8xf32>
    %15 = vector.shape_cast %14 : vector<1x1x8xf32> to vector<1x8xf32>
    %c2 = arith.constant 2 : index
    %c0_15 = arith.constant 0 : index
    %16 = vector.load %arg4[%c2, %c0_15] : memref<22x8xf32, #tpu.memory_space<vmem>>, vector<1x8xf32>
    tpu.vector_store %arg4[%c2, %c0_15], %15 {strides = array<i32>} : memref<22x8xf32, #tpu.memory_space<vmem>>, vector<1x8xf32>,
    %c1_16 = arith.constant 1 : index
    %c1_17 = arith.constant 1 : index
    %17 = memref.load %arg0[%c1_16, %c1_17] : memref<2x8xi32, #tpu.memory_space<smem>>
    %18 = arith.index_cast %17 : i32 to index
    %c0_18 = arith.constant 0 : index
    %c0_19 = arith.constant 0 : index
    %19 = vector.load %arg1[%18, %c0_18, %c0_19] : memref<32x1x8xf32, #tpu.memory_space<vmem>>, vector<1x1x8xf32>
    %20 = vector.shape_cast %19 : vector<1x1x8xf32> to vector<1x8xf32>
    %c3 = arith.constant 3 : index
    %c0_20 = arith.constant 0 : index
    %21 = vector.load %arg4[%c3, %c0_20] : memref<22x8xf32, #tpu.memory_space<vmem>>, vector<1x8xf32>
    tpu.vector_store %arg4[%c3, %c0_20], %20 {strides = array<i32>} : memref<22x8xf32, #tpu.memory_space<vmem>>, vector<1x8xf32>,
    %c0_21 = arith.constant 0 : index
    %c2_22 = arith.constant 2 : index
    %22 = memref.load %arg0[%c0_21, %c2_22] : memref<2x8xi32, #tpu.memory_space<smem>>
    %23 = arith.index_cast %22 : i32 to index
    %c0_23 = arith.constant 0 : index
    %c0_24 = arith.constant 0 : index
    %24 = vector.load %arg1[%23, %c0_23, %c0_24] : memref<32x1x8xf32, #tpu.memory_space<vmem>>, vector<1x1x8xf32>
    %25 = vector.shape_cast %24 : vector<1x1x8xf32> to vector<1x8xf32>
    %c4 = arith.constant 4 : index
    %c0_25 = arith.constant 0 : index
    %26 = vector.load %arg4[%c4, %c0_25] : memref<22x8xf32, #tpu.memory_space<vmem>>, vector<1x8xf32>
    tpu.vector_store %arg4[%c4, %c0_25], %25 {strides = array<i32>} : memref<22x8xf32, #tpu.memory_space<vmem>>, vector<1x8xf32>,
    %c1_26 = arith.constant 1 : index
    %c2_27 = arith.constant 2 : index
    %27 = memref.load %arg0[%c1_26, %c2_27] : memref<2x8xi32, #tpu.memory_space<smem>>
    %28 = arith.index_cast %27 : i32 to index
    %c0_28 = arith.constant 0 : index
    %c0_29 = arith.constant 0 : index
    %29 = vector.load %arg1[%28, %c0_28, %c0_29] : memref<32x1x8xf32, #tpu.memory_space<vmem>>, vector<1x1x8xf32>
    %30 = vector.shape_cast %29 : vector<1x1x8xf32> to vector<1x8xf32>
    %c5 = arith.constant 5 : index
    %c0_30 = arith.constant 0 : index
    %31 = vector.load %arg4[%c5, %c0_30] : memref<22x8xf32, #tpu.memory_space<vmem>>, vector<1x8xf32>
    tpu.vector_store %arg4[%c5, %c0_30], %30 {strides = array<i32>} : memref<22x8xf32, #tpu.memory_space<vmem>>, vector<1x8xf32>,
    %c0_31 = arith.constant 0 : index
    %c3_32 = arith.constant 3 : index
    %32 = memref.load %arg0[%c0_31, %c3_32] : memref<2x8xi32, #tpu.memory_space<smem>>
    %33 = arith.index_cast %32 : i32 to index
    %c0_33 = arith.constant 0 : index
    %c0_34 = arith.constant 0 : index
    %34 = vector.load %arg1[%33, %c0_33, %c0_34] : memref<32x1x8xf32, #tpu.memory_space<vmem>>, vector<1x1x8xf32>
    %35 = vector.shape_cast %34 : vector<1x1x8xf32> to vector<1x8xf32>
    %c6 = arith.constant 6 : index
    %c0_35 = arith.constant 0 : index
    %36 = vector.load %arg4[%c6, %c0_35] : memref<22x8xf32, #tpu.memory_space<vmem>>, vector<1x8xf32>
    tpu.vector_store %arg4[%c6, %c0_35], %35 {strides = array<i32>} : memref<22x8xf32, #tpu.memory_space<vmem>>, vector<1x8xf32>,
    %c1_36 = arith.constant 1 : index
    %c3_37 = arith.constant 3 : index
    %37 = memref.load %arg0[%c1_36, %c3_37] : memref<2x8xi32, #tpu.memory_space<smem>>
    %38 = arith.index_cast %37 : i32 to index
    %c0_38 = arith.constant 0 : index
    %c0_39 = arith.constant 0 : index
    %39 = vector.load %arg1[%38, %c0_38, %c0_39] : memref<32x1x8xf32, #tpu.memory_space<vmem>>, vector<1x1x8xf32>
    %40 = vector.shape_cast %39 : vector<1x1x8xf32> to vector<1x8xf32>
    %c7 = arith.constant 7 : index
    %c0_40 = arith.constant 0 : index
    %41 = vector.load %arg4[%c7, %c0_40] : memref<22x8xf32, #tpu.memory_space<vmem>>, vector<1x8xf32>
    tpu.vector_store %arg4[%c7, %c0_40], %40 {strides = array<i32>} : memref<22x8xf32, #tpu.memory_space<vmem>>, vector<1x8xf32>,
    %c0_41 = arith.constant 0 : index
    %c4_42 = arith.constant 4 : index
    %42 = memref.load %arg0[%c0_41, %c4_42] : memref<2x8xi32, #tpu.memory_space<smem>>
    %43 = arith.index_cast %42 : i32 to index
    %c0_43 = arith.constant 0 : index
    %c0_44 = arith.constant 0 : index
    %44 = vector.load %arg1[%43, %c0_43, %c0_44] : memref<32x1x8xf32, #tpu.memory_space<vmem>>, vector<1x1x8xf32>
    %45 = vector.shape_cast %44 : vector<1x1x8xf32> to vector<1x8xf32>
    %c8 = arith.constant 8 : index
    %c0_45 = arith.constant 0 : index
    %46 = vector.load %arg4[%c8, %c0_45] : memref<22x8xf32, #tpu.memory_space<vmem>>, vector<1x8xf32>
    tpu.vector_store %arg4[%c8, %c0_45], %45 {strides = array<i32>} : memref<22x8xf32, #tpu.memory_space<vmem>>, vector<1x8xf32>,
    %c1_46 = arith.constant 1 : index
    %c4_47 = arith.constant 4 : index
    %47 = memref.load %arg0[%c1_46, %c4_47] : memref<2x8xi32, #tpu.memory_space<smem>>
    %48 = arith.index_cast %47 : i32 to index
    %c0_48 = arith.constant 0 : index
    %c0_49 = arith.constant 0 : index
    %49 = vector.load %arg1[%48, %c0_48, %c0_49] : memref<32x1x8xf32, #tpu.memory_space<vmem>>, vector<1x1x8xf32>
    %50 = vector.shape_cast %49 : vector<1x1x8xf32> to vector<1x8xf32>
    %c9 = arith.constant 9 : index
    %c0_50 = arith.constant 0 : index
    %51 = vector.load %arg4[%c9, %c0_50] : memref<22x8xf32, #tpu.memory_space<vmem>>, vector<1x8xf32>
    tpu.vector_store %arg4[%c9, %c0_50], %50 {strides = array<i32>} : memref<22x8xf32, #tpu.memory_space<vmem>>, vector<1x8xf32>,
    %c0_51 = arith.constant 0 : index
    %c5_52 = arith.constant 5 : index
    %52 = memref.load %arg0[%c0_51, %c5_52] : memref<2x8xi32, #tpu.memory_space<smem>>
    %53 = arith.index_cast %52 : i32 to index
    %c0_53 = arith.constant 0 : index
    %c0_54 = arith.constant 0 : index
    %54 = vector.load %arg1[%53, %c0_53, %c0_54] : memref<32x1x8xf32, #tpu.memory_space<vmem>>, vector<1x1x8xf32>
    %55 = vector.shape_cast %54 : vector<1x1x8xf32> to vector<1x8xf32>
    %c10 = arith.constant 10 : index
    %c0_55 = arith.constant 0 : index
    %56 = vector.load %arg4[%c10, %c0_55] : memref<22x8xf32, #tpu.memory_space<vmem>>, vector<1x8xf32>
    tpu.vector_store %arg4[%c10, %c0_55], %55 {strides = array<i32>} : memref<22x8xf32, #tpu.memory_space<vmem>>, vector<1x8xf32>,
    %c1_56 = arith.constant 1 : index
    %c5_57 = arith.constant 5 : index
    %57 = memref.load %arg0[%c1_56, %c5_57] : memref<2x8xi32, #tpu.memory_space<smem>>
    %58 = arith.index_cast %57 : i32 to index
    %c0_58 = arith.constant 0 : index
    %c0_59 = arith.constant 0 : index
    %59 = vector.load %arg1[%58, %c0_58, %c0_59] : memref<32x1x8xf32, #tpu.memory_space<vmem>>, vector<1x1x8xf32>
    %60 = vector.shape_cast %59 : vector<1x1x8xf32> to vector<1x8xf32>
    %c11 = arith.constant 11 : index
    %c0_60 = arith.constant 0 : index
    %61 = vector.load %arg4[%c11, %c0_60] : memref<22x8xf32, #tpu.memory_space<vmem>>, vector<1x8xf32>
    tpu.vector_store %arg4[%c11, %c0_60], %60 {strides = array<i32>} : memref<22x8xf32, #tpu.memory_space<vmem>>, vector<1x8xf32>,
    %c0_61 = arith.constant 0 : index
    %c6_62 = arith.constant 6 : index
    %62 = memref.load %arg0[%c0_61, %c6_62] : memref<2x8xi32, #tpu.memory_space<smem>>
    %63 = arith.index_cast %62 : i32 to index
    %c0_63 = arith.constant 0 : index
    %c0_64 = arith.constant 0 : index
    %64 = vector.load %arg1[%63, %c0_63, %c0_64] : memref<32x1x8xf32, #tpu.memory_space<vmem>>, vector<1x1x8xf32>
    %65 = vector.shape_cast %64 : vector<1x1x8xf32> to vector<1x8xf32>
    %c12 = arith.constant 12 : index
    %c0_65 = arith.constant 0 : index
    %66 = vector.load %arg4[%c12, %c0_65] : memref<22x8xf32, #tpu.memory_space<vmem>>, vector<1x8xf32>
    tpu.vector_store %arg4[%c12, %c0_65], %65 {strides = array<i32>} : memref<22x8xf32, #tpu.memory_space<vmem>>, vector<1x8xf32>,
    %c1_66 = arith.constant 1 : index
    %c6_67 = arith.constant 6 : index
    %67 = memref.load %arg0[%c1_66, %c6_67] : memref<2x8xi32, #tpu.memory_space<smem>>
    %68 = arith.index_cast %67 : i32 to index
    %c0_68 = arith.constant 0 : index
    %c0_69 = arith.constant 0 : index
    %69 = vector.load %arg1[%68, %c0_68, %c0_69] : memref<32x1x8xf32, #tpu.memory_space<vmem>>, vector<1x1x8xf32>
    %70 = vector.shape_cast %69 : vector<1x1x8xf32> to vector<1x8xf32>
    %c13 = arith.constant 13 : index
    %c0_70 = arith.constant 0 : index
    %71 = vector.load %arg4[%c13, %c0_70] : memref<22x8xf32, #tpu.memory_space<vmem>>, vector<1x8xf32>
    tpu.vector_store %arg4[%c13, %c0_70], %70 {strides = array<i32>} : memref<22x8xf32, #tpu.memory_space<vmem>>, vector<1x8xf32>,
    %c0_71 = arith.constant 0 : index
    %c7_72 = arith.constant 7 : index
    %72 = memref.load %arg0[%c0_71, %c7_72] : memref<2x8xi32, #tpu.memory_space<smem>>
    %73 = arith.index_cast %72 : i32 to index
    %c0_73 = arith.constant 0 : index
    %c0_74 = arith.constant 0 : index
    %74 = vector.load %arg1[%73, %c0_73, %c0_74] : memref<32x1x8xf32, #tpu.memory_space<vmem>>, vector<1x1x8xf32>
    %75 = vector.shape_cast %74 : vector<1x1x8xf32> to vector<1x8xf32>
    %c14 = arith.constant 14 : index
    %c0_75 = arith.constant 0 : index
    %76 = vector.load %arg4[%c14, %c0_75] : memref<22x8xf32, #tpu.memory_space<vmem>>, vector<1x8xf32>
    tpu.vector_store %arg4[%c14, %c0_75], %75 {strides = array<i32>} : memref<22x8xf32, #tpu.memory_space<vmem>>, vector<1x8xf32>,
    %c1_76 = arith.constant 1 : index
    %c7_77 = arith.constant 7 : index
    %77 = memref.load %arg0[%c1_76, %c7_77] : memref<2x8xi32, #tpu.memory_space<smem>>
    %78 = arith.index_cast %77 : i32 to index
    %c0_78 = arith.constant 0 : index
    %c0_79 = arith.constant 0 : index
    %79 = vector.load %arg1[%78, %c0_78, %c0_79] : memref<32x1x8xf32, #tpu.memory_space<vmem>>, vector<1x1x8xf32>
    %80 = vector.shape_cast %79 : vector<1x1x8xf32> to vector<1x8xf32>
    %c15 = arith.constant 15 : index
    %c0_80 = arith.constant 0 : index
    %81 = vector.load %arg4[%c15, %c0_80] : memref<22x8xf32, #tpu.memory_space<vmem>>, vector<1x8xf32>
    tpu.vector_store %arg4[%c15, %c0_80], %80 {strides = array<i32>} : memref<22x8xf32, #tpu.memory_space<vmem>>, vector<1x8xf32>,
    %cst_81 = arith.constant 0.000000e+00 : f32
    %82 = vector.broadcast %cst_81 : f32 to vector<14x12xf32>
    %c0_82 = arith.constant 0 : index
    %c0_83 = arith.constant 0 : index
    %83 = vector.load %arg4[%c0_82, %c0_83] : memref<22x8xf32, #tpu.memory_space<vmem>>, vector<14x8xf32>
    %c0_84 = arith.constant 0 : index
    %c0_85 = arith.constant 0 : index
    %84 = vector.load %arg2[%c0_84, %c0_85] : memref<64x12xf32, #tpu.memory_space<vmem>>, vector<8x12xf32>
    %cst_86 = arith.constant dense<0.000000e+00> : vector<14x12xf32>
    %85 = tpu.matmul %83, %84, %cst_86 {dimension_numbers = #tpu.dot_dimension_numbers<[1], [0], [0], [1], [0, 0, 1, 1], [], []>} : vector<14x8xf32>, vector<8x12xf32>, vector<14x12xf32> -> vector<14x12xf32>
    %86 = arith.addf %82, %85 : vector<14x12xf32>
    %c2_87 = arith.constant 2 : index
    %c0_88 = arith.constant 0 : index
    %87 = vector.load %arg4[%c2_87, %c0_88] : memref<22x8xf32, #tpu.memory_space<vmem>>, vector<14x8xf32>
    %c8_89 = arith.constant 8 : index
    %c0_90 = arith.constant 0 : index
    %88 = vector.load %arg2[%c8_89, %c0_90] : memref<64x12xf32, #tpu.memory_space<vmem>>, vector<8x12xf32>
    %cst_91 = arith.constant dense<0.000000e+00> : vector<14x12xf32>
    %89 = tpu.matmul %87, %88, %cst_91 {dimension_numbers = #tpu.dot_dimension_numbers<[1], [0], [0], [1], [0, 0, 1, 1], [], []>} : vector<14x8xf32>, vector<8x12xf32>, vector<14x12xf32> -> vector<14x12xf32>
    %90 = arith.addf %86, %89 : vector<14x12xf32>
    %c4_92 = arith.constant 4 : index
    %c0_93 = arith.constant 0 : index
    %91 = vector.load %arg4[%c4_92, %c0_93] : memref<22x8xf32, #tpu.memory_space<vmem>>, vector<14x8xf32>
    %c16_94 = arith.constant 16 : index
    %c0_95 = arith.constant 0 : index
    %92 = vector.load %arg2[%c16_94, %c0_95] : memref<64x12xf32, #tpu.memory_space<vmem>>, vector<8x12xf32>
    %cst_96 = arith.constant dense<0.000000e+00> : vector<14x12xf32>
    %93 = tpu.matmul %91, %92, %cst_96 {dimension_numbers = #tpu.dot_dimension_numbers<[1], [0], [0], [1], [0, 0, 1, 1], [], []>} : vector<14x8xf32>, vector<8x12xf32>, vector<14x12xf32> -> vector<14x12xf32>
    %94 = arith.addf %90, %93 : vector<14x12xf32>
    %c6_97 = arith.constant 6 : index
    %c0_98 = arith.constant 0 : index
    %95 = vector.load %arg4[%c6_97, %c0_98] : memref<22x8xf32, #tpu.memory_space<vmem>>, vector<14x8xf32>
    %c24 = arith.constant 24 : index
    %c0_99 = arith.constant 0 : index
    %96 = vector.load %arg2[%c24, %c0_99] : memref<64x12xf32, #tpu.memory_space<vmem>>, vector<8x12xf32>
    %cst_100 = arith.constant dense<0.000000e+00> : vector<14x12xf32>
    %97 = tpu.matmul %95, %96, %cst_100 {dimension_numbers = #tpu.dot_dimension_numbers<[1], [0], [0], [1], [0, 0, 1, 1], [], []>} : vector<14x8xf32>, vector<8x12xf32>, vector<14x12xf32> -> vector<14x12xf32>
    %98 = arith.addf %94, %97 : vector<14x12xf32>
    %c32 = arith.constant 32 : index
    %c0_101 = arith.constant 0 : index
    %99 = vector.load %arg2[%c32, %c0_101] : memref<64x12xf32, #tpu.memory_space<vmem>>, vector<14x12xf32>
    %100 = arith.addf %98, %99 : vector<14x12xf32>
    %cst_102 = arith.constant 0.000000e+00 : f32
    %101 = vector.broadcast %cst_102 : f32 to vector<14x12xf32>
    %102 = arith.maximumf %100, %101 : vector<14x12xf32>
    %103 = vector.extract_strided_slice %102 {offsets = [0, 0], sizes = [2, 12], strides = [1, 1]} : vector<14x12xf32> to vector<2x12xf32>
    %104 = vector.extract_strided_slice %102 {offsets = [2, 0], sizes = [2, 12], strides = [1, 1]} : vector<14x12xf32> to vector<2x12xf32>
    %105 = arith.maximumf %103, %104 : vector<2x12xf32>
    %106 = vector.extract_strided_slice %102 {offsets = [4, 0], sizes = [2, 12], strides = [1, 1]} : vector<14x12xf32> to vector<2x12xf32>
    %107 = arith.maximumf %105, %106 : vector<2x12xf32>
    %108 = vector.extract_strided_slice %102 {offsets = [6, 0], sizes = [2, 12], strides = [1, 1]} : vector<14x12xf32> to vector<2x12xf32>
    %109 = arith.maximumf %107, %108 : vector<2x12xf32>
    %110 = vector.extract_strided_slice %102 {offsets = [8, 0], sizes = [2, 12], strides = [1, 1]} : vector<14x12xf32> to vector<2x12xf32>
    %111 = arith.maximumf %109, %110 : vector<2x12xf32>
    %112 = vector.extract_strided_slice %102 {offsets = [10, 0], sizes = [2, 12], strides = [1, 1]} : vector<14x12xf32> to vector<2x12xf32>
    %113 = arith.maximumf %111, %112 : vector<2x12xf32>
    %114 = vector.extract_strided_slice %102 {offsets = [12, 0], sizes = [2, 12], strides = [1, 1]} : vector<14x12xf32> to vector<2x12xf32>
    %115 = arith.maximumf %113, %114 : vector<2x12xf32>
    %c48 = arith.constant 48 : index
    %c0_103 = arith.constant 0 : index
    %116 = vector.load %arg2[%c48, %c0_103] : memref<64x12xf32, #tpu.memory_space<vmem>>, vector<12x2xf32>
    %c60 = arith.constant 60 : index
    %c0_104 = arith.constant 0 : index
    %117 = vector.load %arg2[%c60, %c0_104] : memref<64x12xf32, #tpu.memory_space<vmem>>, vector<1x2xf32>
    %cst_105 = arith.constant dense<0.000000e+00> : vector<2x2xf32>
    %118 = tpu.matmul %115, %116, %cst_105 {dimension_numbers = #tpu.dot_dimension_numbers<[1], [0], [0], [1], [0, 0, 1, 1], [], []>} : vector<2x12xf32>, vector<12x2xf32>, vector<2x2xf32> -> vector<2x2xf32>
    %119 = vector.broadcast %117 : vector<1x2xf32> to vector<2x2xf32>
    %120 = arith.addf %118, %119 : vector<2x2xf32>
    %c0_106 = arith.constant 0 : index
    %c0_107 = arith.constant 0 : index
    %121 = vector.load %arg3[%c0_106, %c0_107] : memref<2x2xf32, #tpu.memory_space<vmem>>, vector<2x2xf32>
    tpu.vector_store %arg3[%c0_106, %c0_107], %120 {strides = array<i32>} : memref<2x2xf32, #tpu.memory_space<vmem>>, vector<2x2xf32>,
    return
  }
}

</mosaic_0001>

<bundles_post_ra>
// kernel: textcnn_forward.1
= control target key start
LH: loop header
LB: loop body
LE: loop exit
PB: predicated region body
PF: predicated region fallthrough
CT: control target
= control target key end

     0   :  { %8 = vsyncpa [#allocation5], 0  ;;  %s870_s0 = inlined_call_operand.vmem [shape: s32[2,8], index: 0, kind: input, shape index: {}]   ;;  %s871_s1 = inlined_call_operand.vmem [shape: f32[32,1,8], index: 1, kind: input, shape index: {}]   ;;  %s872_s2 = inlined_call_operand.vmem [shape: f32[64,12], index: 2, kind: input, shape index: {}]   ;;  %s873_s3 = inlined_call_operand.hbm [shape: f32[2,2], index: 3, kind: output, shape index: {}]  }
   0x1   :  { %9 = vsyncpa [#allocation4], 0  ;;  %s16_s14 = sshll.u32 %s870_s0, 4  ;;  %s17_s14 = int_to_ptr.vmem [resolvable:$true] %s16_s14 }
   0x2   :  { %s662_s15 = scalar_lea.vmem %s17_s14, 32  ;;  %p667_p1 = scmp.lt.s32.totalorder %s17_s14, %s17_s14 }
   0x3   :  { %p663_p0 = scmp.ne.s32.totalorder %s17_s14, %s662_s15  ;;  %p668_p2 = scmp.lt.s32.totalorder %s662_s15, %s662_s15 }
   0x5   :  { %p669_p3 = por %p668_p2, %p667_p1 }
   0x7   :  { %p670_p4 = pnand %p669_p3, %p663_p0 }
   0x9   :  { %673 = shalt.err (!%p670_p4)
}
   0xa   :  { %s700_s16 = smov [#allocation3]  }
   0xb   :  { %19 = dma.vmem_to_smem %s17_s14, 32, %s700_s16, [#allocation5]  }
   0xc   :  { %696 = dma.done.wait [#allocation5], 32  }
   0xd   :  { %697 = vsyncadd [#allocation5], 4294967264 }
   0xe   :  { %27 = sfence }
   0xf   :  { %v97_v0 = vld [vmem:[%s872_s2] sm:$0xff]  ;;  %s30_s19 = sld [smem:[#allocation3]]  ;;  %s579_s0 = sld [smem:[#allocation3 + $0x1]]  ;;  %v735_v1 = vld [vmem:[%s872_s2 + $0x10] sm:$0xff]  ;;  %vm28_vm0 = vcmask 62464   ;;  %v100_v2 = vld [vmem:[%s872_s2 + $0x8] sm:$0xff] }
  0x10   :  { %s578_s20 = sld [smem:[#allocation3 + $0x80]]  ;;  %624 = vmatprep.subr.mxu0 %v97_v0  ;;  %s580_s21 = sld [smem:[#allocation3 + $0x81]]  ;;  %v701_v3 = vmov 0.0   ;;  %619 = vmatprep.subr.mxu1 %v100_v2  ;;  %vm33_vm1 = vcmask 57344   ;;  %vm101_vm2 = vcmask 64512   ;;  %v352_v24 = vld [vmem:[%s872_s2 + $0x18] sm:$0xff] }
  0x11   :  { %625 = vmatpush3.msra.mxu0 %v97_v0  ;;  %s737_s24 = sld [smem:[#allocation3 + $0x2]]  ;;  %s741_s26 = sld [smem:[#allocation3 + $0x3]]  ;;  %29 = vst.msk [vmem:[#allocation2 + $0x10] sm:$0x3f] %vm28_vm0, %v701_v3  ;;  %620 = vmatpush3.msra.mxu1 %v100_v2  ;;  %v460_v29 = vld [vmem:[%s872_s2 + $0x30] sm:$0xff]  ;;  %vm471_vm3 = vcmask 1043456  }
  0x12   :  { %s739_s25 = sld [smem:[#allocation3 + $0x82]]  ;;  %s743_s27 = sld [smem:[#allocation3 + $0x83]]  ;;  %629 = vmatprep.subr.mxu0 %v735_v1  ;;  %v461_v30 = vld [vmem:[%s872_s2 + $0x38] sm:$0xf]  ;;  %v702_v31 = vmov 0.0|0.0   ;;  %vm703_vm4 = vmmov 1  }
  0x13   :  { %s749_s30 = sld [smem:[#allocation3 + $0x4]]  ;;  %s754_s5 = sld [smem:[#allocation3 + $0x5]]  ;;  %646 = vmatprep.subr.bf16.mxu1 %v702_v31  ;;  %v647_v32 = vpack.c.bf16 %v461_v30, %v460_v29  ;;  %vm648_vm5 = vmpackc.low %vm471_vm3, %vm703_vm4  ;;  %vm704_vm6 = vmmov 0   ;;  %v436_v38 = vld [vmem:[%s872_s2 + $0x20] sm:$0xff]  ;;  %v437_v41 = vld [vmem:[%s872_s2 + $0x28] sm:$0x3f] }
  0x14   :  { %s751_s4 = sld [smem:[#allocation3 + $0x84]]  ;;  %s756_s6 = sld [smem:[#allocation3 + $0x85]]  ;;  %vm467_vm7 = vcmask 97280   ;;  %v601_v56 = vld [vmem:[%s872_s2 + $0x3c] ss:$0 sm:$0xff]  ;;  %vm545_vm8 = vcmask 9216  }
  0x15   :  { %s31_s9 = scalar_lea.vmem %s871_s1, %s30_s19  ;;  %s40_s15 = scalar_lea.vmem %s871_s1, %s579_s0 }
  0x16   :  { %s36_s12 = scalar_lea.vmem %s871_s1, %s578_s20  ;;  %v32_v4 = vld [vmem:[%s31_s9] sm:$0x1]  ;;  %s44_s18 = scalar_lea.vmem %s871_s1, %s580_s21 }
  0x17   :  { %v37_v5 = vld [vmem:[%s36_s12] sm:$0x1]  ;;  %34 = vst.msk [vmem:[#allocation2] sm:$0x1] %vm33_vm1, %v32_v4  ;;  %s48_s22 = scalar_lea.vmem %s871_s1, %s737_s24  ;;  %s56_s7 = scalar_lea.vmem %s871_s1, %s741_s26 }
  0x18   :  { %38 = vst.msk [vmem:[#allocation2 + $0x1] sm:$0x1] %vm33_vm1, %v37_v5  ;;  %v41_v6 = vld [vmem:[%s40_s15] sm:$0x1]  ;;  %s52_s0 = scalar_lea.vmem %s871_s1, %s739_s25  ;;  %s60_s24 = scalar_lea.vmem %s871_s1, %s743_s27 }
  0x19   :  { %v45_v7 = vld [vmem:[%s44_s18] sm:$0x1]  ;;  %42 = vst.msk [vmem:[#allocation2 + $0x2] sm:$0x1] %vm33_vm1, %v41_v6  ;;  %s64_s11 = scalar_lea.vmem %s871_s1, %s749_s30  ;;  %s72_s15 = scalar_lea.vmem %s871_s1, %s754_s5 }
  0x1a   :  { %46 = vst.msk [vmem:[#allocation2 + $0x3] sm:$0x1] %vm33_vm1, %v45_v7  ;;  %v49_v8 = vld [vmem:[%s48_s22] sm:$0x1]  ;;  %s68_s14 = scalar_lea.vmem %s871_s1, %s751_s4  ;;  %s76_s18 = scalar_lea.vmem %s871_s1, %s756_s6 }
  0x1b   :  { %v53_v9 = vld [vmem:[%s52_s0] sm:$0x1]  ;;  %50 = vst.msk [vmem:[#allocation2 + $0x4] sm:$0x1] %vm33_vm1, %v49_v8  ;;  %s589_s30 = sld [smem:[#allocation3 + $0x6]]  ;;  %s591_s19 = sld [smem:[#allocation3 + $0x7]] }
  0x1c   :  { %54 = vst.msk [vmem:[#allocation2 + $0x5] sm:$0x1] %vm33_vm1, %v53_v9  ;;  %v57_v10 = vld [vmem:[%s56_s7] sm:$0x1]  ;;  %s590_s4 = sld [smem:[#allocation3 + $0x86]]  ;;  %s592_s20 = sld [smem:[#allocation3 + $0x87]] }
  0x1d   :  { %v61_v11 = vld [vmem:[%s60_s24] sm:$0x1]  ;;  %58 = vst.msk [vmem:[#allocation2 + $0x6] sm:$0x1] %vm33_vm1, %v57_v10 }
  0x1e   :  { %62 = vst.msk [vmem:[#allocation2 + $0x7] sm:$0x1] %vm33_vm1, %v61_v11  ;;  %v65_v12 = vld [vmem:[%s64_s11] sm:$0x1] }
  0x1f   :  { %v69_v13 = vld [vmem:[%s68_s14] sm:$0x1]  ;;  %66 = vst.msk [vmem:[#allocation2 + $0x8] sm:$0x1] %vm33_vm1, %v65_v12 }
  0x20   :  { %70 = vst.msk [vmem:[#allocation2 + $0x9] sm:$0x1] %vm33_vm1, %v69_v13  ;;  %v73_v14 = vld [vmem:[%s72_s15] sm:$0x1] }
  0x21   :  { %v77_v15 = vld [vmem:[%s76_s18] sm:$0x1]  ;;  %74 = vst.msk [vmem:[#allocation2 + $0xa] sm:$0x1] %vm33_vm1, %v73_v14  ;;  %s80_s6 = scalar_lea.vmem %s871_s1, %s589_s30  ;;  %s88_s7 = scalar_lea.vmem %s871_s1, %s591_s19 }
  0x22   :  { %78 = vst.msk [vmem:[#allocation2 + $0xb] sm:$0x1] %vm33_vm1, %v77_v15  ;;  %v81_v17 = vld [vmem:[%s80_s6] sm:$0x1]  ;;  %s84_s0 = scalar_lea.vmem %s871_s1, %s590_s4  ;;  %s92_s24 = scalar_lea.vmem %s871_s1, %s592_s20 }
  0x23   :  { %82 = vst.msk [vmem:[#allocation2 + $0xc] sm:$0x1] %vm33_vm1, %v81_v17  ;;  %v85_v19 = vld [vmem:[%s84_s0] sm:$0x1]  ;;  %s705_s18 = smov [#allocation6]  }
  0x24   :  { %v89_v20 = vld [vmem:[%s88_s7] sm:$0x1]  ;;  %86 = vst.msk [vmem:[#allocation2 + $0xd] sm:$0x1] %vm33_vm1, %v85_v19  ;;  %s553_s30 = sshll.u32 %s705_s18, 4  ;;  %s554_s30 = int_to_ptr.vmem [resolvable:$true] %s553_s30 }
  0x25   :  { %v95_v16 = vld [vmem:[#allocation2] sm:$0xff]  ;;  %90 = vst.msk [vmem:[#allocation2 + $0xe] sm:$0x1] %vm33_vm1, %v89_v20  ;;  %s674_s4 = scalar_lea.vmem %s554_s30, 32  ;;  %p679_p6 = scmp.lt.s32.totalorder %s554_s30, %s554_s30 }
  0x26   :  { %626 = vmatprep.mubr.msk.f32.mxu0 %vm101_vm2, %v95_v16  ;;  %v93_v21 = vld [vmem:[%s92_s24] sm:$0x1]  ;;  %p675_p5 = scmp.ne.s32.totalorder %s554_s30, %s674_s4  ;;  %p680_p7 = scmp.lt.s32.totalorder %s674_s4, %s674_s4 }
  0x27   :  { %v98_v18 = vld [vmem:[#allocation2 + $0x2] sm:$0xff]  ;;  %94 = vst.msk [vmem:[#allocation2 + $0xf] sm:$0x1] %vm33_vm1, %v93_v21 }
  0x28   :  { %621 = vmatprep.mubr.msk.f32.mxu1 %vm101_vm2, %v98_v18  ;;  %p681_p8 = por %p680_p7, %p679_p6 }
  0x29   :  { %v264_v22 = vld [vmem:[#allocation2 + $0x4] sm:$0xff] }
  0x2a   :  { %p682_p9 = pnand %p681_p8, %p675_p5 }
  0x2b   :  { %v96_v23 = vld [vmem:[#allocation2 + $0x8] sm:$0x3f] }
  0x2c   :  { %627 = vmatmul.mubr.msk.f32.vlgmr.msra.gmra.mrb[0].mxu0 %vm101_vm2, %v96_v23  ;;  %v350_v27 = vld [vmem:[#allocation2 + $0x6] sm:$0xff] }
  0x2d   :  { %630 = vmatpush3.msra.mxu0 %v735_v1  ;;  %631 = vmatprep.mubr.msk.f32.mxu0 %vm101_vm2, %v264_v22 }
  0x2e   :  { %v99_v25 = vld [vmem:[#allocation2 + $0xa] sm:$0x3f]  ;;  %634 = vmatprep.subr.mxu0 %v352_v24 }
  0x2f   :  { %622 = vmatmul.mubr.msk.f32.vlgmr.msra.gmra.mrb[0].mxu1 %vm101_vm2, %v99_v25  ;;  %v265_v26 = vld [vmem:[#allocation2 + $0xc] sm:$0x3f] }
  0x30   :  { %v351_v28 = vld [vmem:[#allocation2 + $0xe] sm:$0x3f]  ;;  %643 = vmatprep.mubr.msk.f32.mxu1 %vm704_vm6, %v701_v3  ;;  %649 = vmatpush3.bf16.msk.msra.mxu1 %vm648_vm5, %v647_v32 }
  0x34   :  { %632 = vmatmul.mubr.msk.f32.vlgmr.msra.gmra.mrb[0].mxu0 %vm101_vm2, %v265_v26 }
  0x35   :  { %635 = vmatpush3.msra.mxu0 %v352_v24  ;;  %636 = vmatprep.mubr.msk.f32.mxu0 %vm101_vm2, %v350_v27 }
  0x3c   :  { %637 = vmatmul.mubr.msk.f32.vlgmr.msra.gmra.mrb[0].mxu0 %vm101_vm2, %v351_v28 }
 0x102   :  { %v623_v33 = vpop.f32.mrb[0].mxu1 }
 0x103   :  { %v174_v34 = vpop.f32.mrb[1].mxu1 }
 0x10f   :  { %v638_v35 = vpop.f32.mrb[0].mxu0 }
 0x110   :  { %v650_v36 = vadd.f32 %v638_v35, %v623_v33  ;;  %v425_v37 = vpop.f32.mrb[1].mxu0 }
 0x111   :  { %v651_v39 = vadd.f32 %v425_v37, %v174_v34 }
 0x112   :  { %v439_v43 = vadd.f32 %v650_v36, %v437_v41 }
 0x113   :  { %v438_v40 = vadd.f32 %v651_v39, %v436_v38 }
 0x114   :  { %v441_v47 = vmax.f32 %v439_v43, 0.0 }
 0x115   :  { %v440_v42 = vmax.f32 %v438_v40, 0.0 }
 0x116   :  { %v454_v51 = vrot.slane %v441_v47, 2  ;;  %v457_v53 = vrot.slane %v441_v47, 4 }
 0x117   :  { %v443_v44 = vrot.slane %v440_v42, 2  ;;  %v446_v46 = vrot.slane %v440_v42, 4  ;;  %v449_v49 = vrot.slane %v440_v42, 6 }
 0x119   :  { %v445_v45 = vmax.f32 %v440_v42, %v443_v44 }
 0x11b   :  { %v448_v48 = vmax.f32 %v445_v45, %v446_v46 }
 0x11d   :  { %v451_v50 = vmax.f32 %v448_v48, %v449_v49 }
 0x11f   :  { %v452_v52 = vmax.f32 %v451_v50, %v441_v47 }
 0x121   :  { %v456_v54 = vmax.f32 %v452_v52, %v454_v51 }
 0x123   :  { %v459_v55 = vmax.f32 %v456_v54, %v457_v53 }
 0x125   :  { %644 = vmatmul.mubr.msk.f32.vlgmr.msra.gmra.mrb[2].mxu1 %vm467_vm7, %v459_v55 }
 0x1f8   :  { %v541_v57 = vpop.f32.mrb[2].mxu1 }
 0x1f9   :  { %v542_v58 = vadd.f32 %v601_v56, %v541_v57  ;;  %v645_v59 = vpop.f32.mrb[3].mxu1 }
 0x1fb   :  { %546 = vst.msk [vmem:[#allocation6] sm:$0x3] %vm545_vm8, %v542_v58 }
 0x1fc   :  { %685 = shalt.err (!%p682_p9)
}
 0x1fd   :  { %s686_s5 = scalar_lea.hbm %s873_s3, 32 }
 0x1fe   :  { %p687_p10 = scmp.ne.s32.totalorder %s873_s3, %s686_s5  ;;  %p690_p11 = scmp.lt.u32.totalorder %s686_s5, %s873_s3 }
 0x200   :  { %p692_p12 = pnand %p690_p11, %p687_p10 }
 0x202   :  { %695 = shalt.err (!%p692_p12)
}
 0x203   :  { %556 = dma.vmem_to_hbm [thread:$0]  %s554_s30, 32, %s873_s3, [#allocation4]  }
 0x204   :  { %698 = dma.done.wait [#allocation4], 32  }
 0x205   :  { %699 = vsyncadd [#allocation4], 4294967264 }
 0x206   :  { %560 = vsyncpa [#allocation4], 1 }
 0x207   :  { %561 = vsyncpa [#allocation5], 1 }

</bundles_post_ra>
